<compile_context>
chip_gen: v7x
topology: tpu7x:2x2x1
jax: 0.10.0
libtpu: 0.0.40
codegen_flags: <defaults>
</compile_context>

<pallas_src>
import functools

import jax
import jax.numpy as jnp
from jax import lax
from jax.experimental import pallas as pl
from jax.experimental.pallas import tpu as pltpu


_NEG_INF = -1e30  # finite "minus infinity": avoids inf/nan arithmetic paths


def _flash_attend_kernel(q_ref, k_ref, v_ref, o_ref,
                         m_sc, l_sc, acc_sc, qs_sc,
                         *, scale, kv_len, tk, needs_mask,
                         compute_dtype, exp_dtype):
    # Blocks:  q_ref/o_ref (1, tq, D); k_ref/v_ref (1, tk, D)
    # Scratch: m_sc/l_sc (tq, 1) f32; acc_sc (tq, D) f32; qs_sc (tq, D) compute
    kv = pl.program_id(2)

    @pl.when(kv == 0)
    def _init():
        m_sc[...] = jnp.full_like(m_sc, _NEG_INF)
        l_sc[...] = jnp.zeros_like(l_sc)
        acc_sc[...] = jnp.zeros_like(acc_sc)
        # Hoisted softmax scale: scale q once per resident q tile (f32 mul,
        # then cast to the MXU compute dtype); reuse it for every key step.
        qs_sc[...] = (q_ref[0].astype(jnp.float32) * scale).astype(compute_dtype)

    q = qs_sc[...]                           # (tq, D) pre-scaled, compute dtype
    k = k_ref[0].astype(compute_dtype)       # (tk, D) (no-op cast in common case)
    v = v_ref[0].astype(compute_dtype)       # (tk, D)

    # Scores: contract over D directly (no transpose), f32 MXU accumulation.
    s = lax.dot_general(
        q, k,
        dimension_numbers=(((1,), (1,)), ((), ())),
        preferred_element_type=jnp.float32,
    )                                        # (tq, tk) f32

    if needs_mask:
        # Sequence was padded up to a tile multiple: mask padded key columns.
        key_idx = kv * tk + lax.broadcasted_iota(jnp.int32, s.shape, 1)
        s = jnp.where(key_idx < kv_len, s, _NEG_INF)

    # Online (streaming) softmax update; stats stay in f32.
    m_prev = m_sc[...]
    m_new = jnp.maximum(m_prev, jnp.max(s, axis=-1, keepdims=True))
    alpha = jnp.exp(m_prev - m_new)                          # (tq, 1) f32
    # bf16 exp keeps the EUP at its fast rate on v6e/v7x (binding unit for
    # dim_head <= 128); the result feeds the PV matmul directly.
    p = jnp.exp((s - m_new).astype(exp_dtype))               # (tq, tk)

    l_sc[...] = alpha * l_sc[...] + jnp.sum(
        p.astype(jnp.float32), axis=-1, keepdims=True)
    acc_sc[...] = alpha * acc_sc[...] + lax.dot_general(
        p.astype(compute_dtype), v,
        dimension_numbers=(((1,), (0,)), ((), ())),
        preferred_element_type=jnp.float32,
    )
    m_sc[...] = m_new

    @pl.when(kv == pl.num_programs(2) - 1)
    def _finalize():
        # Runs once per q tile -> use the exact divide (tighter tolerance than
        # the approx reciprocal, at negligible cost).
        o_ref[0] = (acc_sc[...] / l_sc[...]).astype(o_ref.dtype)


def _pick_tile(seq_len, target, floor=128):
    """Tile size <= target for a sequence axis.

    Short sequences get a single full tile. Otherwise prefer the largest
    multiple-of-8 divisor of seq_len in [floor, target]; if none exists,
    return the multiple-of-8 tile minimizing padding (the wrapper then pads
    and masks the ragged tail). Never returns tiny tiles for long sequences
    and never forces an (S, S)-sized block for awkward sequence lengths.
    """
    target = max(floor, target - (target % 8))
    if seq_len <= target:
        return seq_len
    for t in range(target, floor - 1, -8):
        if seq_len % t == 0:
            return t
    best_t, best_pad = target, -(-seq_len // target) * target
    for t in range(target, floor - 1, -8):
        padded = -(-seq_len // t) * t
        if padded < best_pad:
            best_t, best_pad = t, padded
    return best_t


def attend(q, k, v, scale=None, *, tq_target=768, tk_target=512,
           allow_bf16_compute=True):
    """Pallas equivalent of Attend(dropout=0.0, flash=False).forward(q, k, v).

    q, k, v: (B, H, S, D) arrays ("HND" layout). Returns (B, H, S, D).
    """
    B, H, S, D = q.shape
    if scale is None:
        scale = float(D) ** -0.5
    out_dtype = q.dtype

    # TODO(synk): training-mode attention dropout not implemented (dropout=0.0).

    # The MXU is bf16-native on v5e/v6e/v7x: run both matmuls in bf16 with f32
    # accumulation + f32 online-softmax stats when callers pass f32 inputs.
    compute_dtype = q.dtype
    if allow_bf16_compute and q.dtype == jnp.float32:
        compute_dtype = jnp.bfloat16
        q = q.astype(compute_dtype)
        k = k.astype(compute_dtype)
        v = v.astype(compute_dtype)
    exp_dtype = jnp.bfloat16 if compute_dtype == jnp.bfloat16 else jnp.float32

    tq = _pick_tile(S, tq_target)
    tk = _pick_tile(S, tk_target)
    s_q = -(-S // tq) * tq          # padded query length
    s_k = -(-S // tk) * tk          # padded key length
    needs_mask = s_k != S

    BH = B * H
    qf = q.reshape(BH, S, D)
    kf = k.reshape(BH, S, D)
    vf = v.reshape(BH, S, D)
    if s_q != S:
        qf = jnp.pad(qf, ((0, 0), (0, s_q - S), (0, 0)))
    if s_k != S:
        kf = jnp.pad(kf, ((0, 0), (0, s_k - S), (0, 0)))
        vf = jnp.pad(vf, ((0, 0), (0, s_k - S), (0, 0)))

    nq = s_q // tq
    nk = s_k // tk

    # Put the larger of (q_tiles, batch*heads) first so v7x's two TensorCores
    # get balanced work even for single-head / single-batch calls.
    q_major = nq >= BH
    grid = (nq, BH, nk) if q_major else (BH, nq, nk)

    def _bh_qi(g0, g1):
        return (g1, g0) if q_major else (g0, g1)

    def q_index(g0, g1, kv):
        b, qi = _bh_qi(g0, g1)
        return (b, qi, 0)

    def kv_index(g0, g1, kv):
        b, _ = _bh_qi(g0, g1)
        return (b, kv, 0)

    kernel = functools.partial(
        _flash_attend_kernel, scale=scale, kv_len=S, tk=tk,
        needs_mask=needs_mask, compute_dtype=compute_dtype, exp_dtype=exp_dtype)

    # TODO(synk): for dim_head < 128 the output / PV lane dim is sub-128
    # (masked stores, partially used MXU columns); packing 128//D heads into
    # one lane-dense slab needs a wrapper-side transpose and is left out here.

    of = pl.pallas_call(
        kernel,
        out_shape=jax.ShapeDtypeStruct((BH, s_q, D), out_dtype),
        grid_spec=pltpu.PrefetchScalarGridSpec(
            num_scalar_prefetch=0,
            grid=grid,
            in_specs=[
                pl.BlockSpec((1, tq, D), q_index),
                pl.BlockSpec((1, tk, D), kv_index),
                pl.BlockSpec((1, tk, D), kv_index),
            ],
            # Output block constant across the key axis -> resident across the
            # reduction; written once at the last key step.
            out_specs=pl.BlockSpec((1, tq, D), q_index),
            scratch_shapes=[
                pltpu.VMEM((tq, 1), jnp.float32),     # running max
                pltpu.VMEM((tq, 1), jnp.float32),     # running sum
                pltpu.VMEM((tq, D), jnp.float32),     # f32 output accumulator
                pltpu.VMEM((tq, D), compute_dtype),   # pre-scaled q tile
            ],
        ),
        compiler_params=pltpu.CompilerParams(
            dimension_semantics=("parallel", "parallel", "arbitrary"),
            # Worst-case working set with the default tiles is < 10 MiB; 48 MiB
            # leaves room for larger user tiles while staying inside v7x's
            # 64 MiB physical VMEM per TensorCore.
            vmem_limit_bytes=48 * 1024 * 1024,
        ),
    )(qf, kf, vf)

    if s_q != S:
        of = of[:, :S, :]
    return of.reshape(B, H, S, D)


def attend_reference(q, k, v, scale=None):
    """Pure-JAX f32 reference mirroring the PyTorch einsum path."""
    D = q.shape[-1]
    if scale is None:
        scale = float(D) ** -0.5
    q32 = q.astype(jnp.float32)
    k32 = k.astype(jnp.float32)
    v32 = v.astype(jnp.float32)
    sim = jnp.einsum("bhid,bhjd->bhij", q32, k32) * scale
    attn = jax.nn.softmax(sim, axis=-1)
    return jnp.einsum("bhij,bhjd->bhid", attn, v32)


if __name__ == "__main__":
    key = jax.random.PRNGKey(0)

    # Small shape matching the module layout: (batch, heads, seq_len, dim_head)
    B, H, S, D = 2, 4, 8, 32
    kq, kk, kv_ = jax.random.split(key, 3)
    q = jax.random.normal(kq, (B, H, S, D), dtype=jnp.float32)
    k = jax.random.normal(kk, (B, H, S, D), dtype=jnp.float32)
    v = jax.random.normal(kv_, (B, H, S, D), dtype=jnp.float32)

    out = jax.block_until_ready(attend(q, k, v))
    ref = attend_reference(q, k, v)
    assert out.shape == (B, H, S, D)
    # bf16 MXU/EUP compute with f32 accumulation -> ~1e-2-class tolerance.
    err = float(jnp.max(jnp.abs(out.astype(jnp.float32) - ref)))
    assert jnp.allclose(out.astype(jnp.float32), ref, atol=2e-2, rtol=2e-2), err

    # Also exercise the tiled + padded/masked path (ragged seq_len, >1 k tile).
    B2, H2, S2, D2 = 1, 2, 200, 32
    kq2, kk2, kv2 = jax.random.split(jax.random.PRNGKey(1), 3)
    q2 = jax.random.normal(kq2, (B2, H2, S2, D2), dtype=jnp.float32)
    k2 = jax.random.normal(kk2, (B2, H2, S2, D2), dtype=jnp.float32)
    v2 = jax.random.normal(kv2, (B2, H2, S2, D2), dtype=jnp.float32)
    out2 = jax.block_until_ready(
        attend(q2, k2, v2, tq_target=128, tk_target=128))
    ref2 = attend_reference(q2, k2, v2)
    err2 = float(jnp.max(jnp.abs(out2.astype(jnp.float32) - ref2)))
    assert jnp.allclose(out2.astype(jnp.float32), ref2, atol=2e-2, rtol=2e-2), err2

    print("KERNEL_OK")
</pallas_src>

<mosaic_0001>
module attributes {stable_mosaic.version = 11 : i64} {
  func.func @_flash_attend_kernel(%arg0: i32, %arg1: i32, %arg2: i32, %arg3: memref<1x8x32xbf16, #tpu.memory_space<vmem>>, %arg4: memref<1x8x32xbf16, #tpu.memory_space<vmem>>, %arg5: memref<1x8x32xbf16, #tpu.memory_space<vmem>>, %arg6: memref<1x8x32xf32, #tpu.memory_space<vmem>>, %arg7: memref<8x1xf32, #tpu.memory_space<vmem>>, %arg8: memref<8x1xf32, #tpu.memory_space<vmem>>, %arg9: memref<8x32xf32, #tpu.memory_space<vmem>>, %arg10: memref<8x32xbf16, #tpu.memory_space<vmem>>) attributes {dimension_semantics = [#tpu.dimension_semantics<parallel>, #tpu.dimension_semantics<parallel>, #tpu.dimension_semantics<arbitrary>], iteration_bounds = array<i64: 8, 1, 1>, scalar_prefetch = 0 : i64, scratch_operands = 4 : i64, tpu.core_type = #tpu.core_type<tc>, window_params = [{transform_indices = @transform_0, window_bounds = array<i64: 1, 8, 32>}, {transform_indices = @transform_1, window_bounds = array<i64: 1, 8, 32>}, {transform_indices = @transform_2, window_bounds = array<i64: 1, 8, 32>}, {transform_indices = @transform_3, window_bounds = array<i64: 1, 8, 32>}]} {
    %c0_i32 = arith.constant 0 : i32
    %0 = arith.cmpi eq, %arg2, %c0_i32 : i32
    %1 = arith.extui %0 : i1 to i32
    %c0_i32_0 = arith.constant 0 : i32
    %2 = arith.cmpi ne, %1, %c0_i32_0 : i32
    scf.if %2 {
      %cst_25 = arith.constant -1.000000e+30 : f32
      %36 = vector.broadcast %cst_25 : f32 to vector<8x1xf32>
      %c0_26 = arith.constant 0 : index
      %c0_27 = arith.constant 0 : index
      %37 = vector.load %arg7[%c0_26, %c0_27] : memref<8x1xf32, #tpu.memory_space<vmem>>, vector<8x1xf32>
      tpu.vector_store %arg7[%c0_26, %c0_27], %36 {strides = array<i32>} : memref<8x1xf32, #tpu.memory_space<vmem>>, vector<8x1xf32>,
      %cst_28 = arith.constant 0.000000e+00 : f32
      %38 = vector.broadcast %cst_28 : f32 to vector<8x1xf32>
      %c0_29 = arith.constant 0 : index
      %c0_30 = arith.constant 0 : index
      %39 = vector.load %arg8[%c0_29, %c0_30] : memref<8x1xf32, #tpu.memory_space<vmem>>, vector<8x1xf32>
      tpu.vector_store %arg8[%c0_29, %c0_30], %38 {strides = array<i32>} : memref<8x1xf32, #tpu.memory_space<vmem>>, vector<8x1xf32>,
      %cst_31 = arith.constant 0.000000e+00 : f32
      %40 = vector.broadcast %cst_31 : f32 to vector<8x32xf32>
      %c0_32 = arith.constant 0 : index
      %c0_33 = arith.constant 0 : index
      %41 = vector.load %arg9[%c0_32, %c0_33] : memref<8x32xf32, #tpu.memory_space<vmem>>, vector<8x32xf32>
      tpu.vector_store %arg9[%c0_32, %c0_33], %40 {strides = array<i32>} : memref<8x32xf32, #tpu.memory_space<vmem>>, vector<8x32xf32>,
      %c0_34 = arith.constant 0 : index
      %c0_35 = arith.constant 0 : index
      %c0_36 = arith.constant 0 : index
      %42 = vector.load %arg3[%c0_34, %c0_35, %c0_36] : memref<1x8x32xbf16, #tpu.memory_space<vmem>>, vector<1x8x32xbf16>
      %43 = vector.shape_cast %42 : vector<1x8x32xbf16> to vector<8x32xbf16>
      %44 = arith.extf %43 : vector<8x32xbf16> to vector<8x32xf32>
      %cst_37 = arith.constant 0.176776692 : f32
      %45 = vector.broadcast %cst_37 : f32 to vector<8x32xf32>
      %46 = arith.mulf %44, %45 : vector<8x32xf32>
      %47 = arith.truncf %46 : vector<8x32xf32> to vector<8x32xbf16>
      %c0_38 = arith.constant 0 : index
      %c0_39 = arith.constant 0 : index
      %48 = vector.load %arg10[%c0_38, %c0_39] : memref<8x32xbf16, #tpu.memory_space<vmem>>, vector<8x32xbf16>
      tpu.vector_store %arg10[%c0_38, %c0_39], %47 {strides = array<i32>} : memref<8x32xbf16, #tpu.memory_space<vmem>>, vector<8x32xbf16>,
    } else {
    }
    %c0 = arith.constant 0 : index
    %c0_1 = arith.constant 0 : index
    %3 = vector.load %arg10[%c0, %c0_1] : memref<8x32xbf16, #tpu.memory_space<vmem>>, vector<8x32xbf16>
    %c0_2 = arith.constant 0 : index
    %c0_3 = arith.constant 0 : index
    %c0_4 = arith.constant 0 : index
    %4 = vector.load %arg4[%c0_2, %c0_3, %c0_4] : memref<1x8x32xbf16, #tpu.memory_space<vmem>>, vector<1x8x32xbf16>
    %5 = vector.shape_cast %4 : vector<1x8x32xbf16> to vector<8x32xbf16>
    %c0_5 = arith.constant 0 : index
    %c0_6 = arith.constant 0 : index
    %c0_7 = arith.constant 0 : index
    %6 = vector.load %arg5[%c0_5, %c0_6, %c0_7] : memref<1x8x32xbf16, #tpu.memory_space<vmem>>, vector<1x8x32xbf16>
    %7 = vector.shape_cast %6 : vector<1x8x32xbf16> to vector<8x32xbf16>
    %cst = arith.constant dense<0.000000e+00> : vector<8x8xf32>
    %8 = tpu.matmul %3, %5, %cst {dimension_numbers = #tpu.dot_dimension_numbers<[1], [1], [0], [0], [0, 0, 1, 0], [], []>} : vector<8x32xbf16>, vector<8x32xbf16>, vector<8x8xf32> -> vector<8x8xf32>
    %c0_8 = arith.constant 0 : index
    %c0_9 = arith.constant 0 : index
    %9 = vector.load %arg7[%c0_8, %c0_9] : memref<8x1xf32, #tpu.memory_space<vmem>>, vector<8x1xf32>
    %cst_10 = arith.constant dense<0xFF800000> : vector<8xf32>
    %10 = vector.multi_reduction <maximumf>, %8, %cst_10 [1] : vector<8x8xf32> to vector<8xf32>
    %11 = vector.shape_cast %10 : vector<8xf32> to vector<8x1xf32>
    %12 = arith.maximumf %9, %11 : vector<8x1xf32>
    %13 = arith.subf %9, %12 : vector<8x1xf32>
    %14 = math.exp %13 : vector<8x1xf32>
    %15 = vector.broadcast %12 : vector<8x1xf32> to vector<8x8xf32>
    %16 = arith.subf %8, %15 : vector<8x8xf32>
    %17 = arith.truncf %16 : vector<8x8xf32> to vector<8x8xbf16>
    %18 = math.exp %17 : vector<8x8xbf16>
    %c0_11 = arith.constant 0 : index
    %c0_12 = arith.constant 0 : index
    %19 = vector.load %arg8[%c0_11, %c0_12] : memref<8x1xf32, #tpu.memory_space<vmem>>, vector<8x1xf32>
    %20 = arith.mulf %14, %19 : vector<8x1xf32>
    %21 = arith.extf %18 : vector<8x8xbf16> to vector<8x8xf32>
    %cst_13 = arith.constant dense<0.000000e+00> : vector<8xf32>
    %22 = vector.multi_reduction <add>, %21, %cst_13 [1] : vector<8x8xf32> to vector<8xf32>
    %23 = vector.shape_cast %22 : vector<8xf32> to vector<8x1xf32>
    %24 = arith.addf %20, %23 : vector<8x1xf32>
    %c0_14 = arith.constant 0 : index
    %c0_15 = arith.constant 0 : index
    %25 = vector.load %arg8[%c0_14, %c0_15] : memref<8x1xf32, #tpu.memory_space<vmem>>, vector<8x1xf32>
    tpu.vector_store %arg8[%c0_14, %c0_15], %24 {strides = array<i32>} : memref<8x1xf32, #tpu.memory_space<vmem>>, vector<8x1xf32>,
    %c0_16 = arith.constant 0 : index
    %c0_17 = arith.constant 0 : index
    %26 = vector.load %arg9[%c0_16, %c0_17] : memref<8x32xf32, #tpu.memory_space<vmem>>, vector<8x32xf32>
    %27 = vector.broadcast %14 : vector<8x1xf32> to vector<8x32xf32>
    %28 = arith.mulf %27, %26 : vector<8x32xf32>
    %cst_18 = arith.constant dense<0.000000e+00> : vector<8x32xf32>
    %29 = tpu.matmul %18, %7, %cst_18 {dimension_numbers = #tpu.dot_dimension_numbers<[1], [0], [0], [1], [0, 0, 1, 1], [], []>} : vector<8x8xbf16>, vector<8x32xbf16>, vector<8x32xf32> -> vector<8x32xf32>
    %30 = arith.addf %28, %29 : vector<8x32xf32>
    %c0_19 = arith.constant 0 : index
    %c0_20 = arith.constant 0 : index
    %31 = vector.load %arg9[%c0_19, %c0_20] : memref<8x32xf32, #tpu.memory_space<vmem>>, vector<8x32xf32>
    tpu.vector_store %arg9[%c0_19, %c0_20], %30 {strides = array<i32>} : memref<8x32xf32, #tpu.memory_space<vmem>>, vector<8x32xf32>,
    %c0_21 = arith.constant 0 : index
    %c0_22 = arith.constant 0 : index
    %32 = vector.load %arg7[%c0_21, %c0_22] : memref<8x1xf32, #tpu.memory_space<vmem>>, vector<8x1xf32>
    tpu.vector_store %arg7[%c0_21, %c0_22], %12 {strides = array<i32>} : memref<8x1xf32, #tpu.memory_space<vmem>>, vector<8x1xf32>,
    %c0_i32_23 = arith.constant 0 : i32
    %33 = arith.cmpi eq, %arg2, %c0_i32_23 : i32
    %34 = arith.extui %33 : i1 to i32
    %c0_i32_24 = arith.constant 0 : i32
    %35 = arith.cmpi ne, %34, %c0_i32_24 : i32
    scf.if %35 {
      %c0_25 = arith.constant 0 : index
      %c0_26 = arith.constant 0 : index
      %36 = vector.load %arg9[%c0_25, %c0_26] : memref<8x32xf32, #tpu.memory_space<vmem>>, vector<8x32xf32>
      %c0_27 = arith.constant 0 : index
      %c0_28 = arith.constant 0 : index
      %37 = vector.load %arg8[%c0_27, %c0_28] : memref<8x1xf32, #tpu.memory_space<vmem>>, vector<8x1xf32>
      %38 = vector.broadcast %37 : vector<8x1xf32> to vector<8x32xf32>
      %39 = arith.divf %36, %38 : vector<8x32xf32>
      %c0_29 = arith.constant 0 : index
      %c0_30 = arith.constant 0 : index
      %c0_31 = arith.constant 0 : index
      %40 = vector.load %arg6[%c0_29, %c0_30, %c0_31] : memref<1x8x32xf32, #tpu.memory_space<vmem>>, vector<1x8x32xf32>
      %41 = vector.shape_cast %40 : vector<1x8x32xf32> to vector<8x32xf32>
      %42 = vector.shape_cast %39 : vector<8x32xf32> to vector<1x8x32xf32>
      tpu.vector_store %arg6[%c0_29, %c0_30, %c0_31], %42 {strides = array<i32>} : memref<1x8x32xf32, #tpu.memory_space<vmem>>, vector<1x8x32xf32>,
    } else {
    }
    return
  }
  func.func @transform_0(%arg0: i32, %arg1: i32, %arg2: i32) -> (i32, i32, i32) {
    %c0_i32 = arith.constant 0 : i32
    %c0_i32_0 = arith.constant 0 : i32
    return %arg0, %arg1, %c0_i32 : i32, i32, i32
  }
  func.func @transform_1(%arg0: i32, %arg1: i32, %arg2: i32) -> (i32, i32, i32) {
    %c0_i32 = arith.constant 0 : i32
    %c0_i32_0 = arith.constant 0 : i32
    return %arg0, %arg2, %c0_i32 : i32, i32, i32
  }
  func.func @transform_2(%arg0: i32, %arg1: i32, %arg2: i32) -> (i32, i32, i32) {
    %c0_i32 = arith.constant 0 : i32
    %c0_i32_0 = arith.constant 0 : i32
    return %arg0, %arg2, %c0_i32 : i32, i32, i32
  }
  func.func @transform_3(%arg0: i32, %arg1: i32, %arg2: i32) -> (i32, i32, i32) {
    %c0_i32 = arith.constant 0 : i32
    %c0_i32_0 = arith.constant 0 : i32
    return %arg0, %arg1, %c0_i32 : i32, i32, i32
  }
}

</mosaic_0001>

<bundles_post_ra>
// kernel: tpu_custom_call.1
= control target key start
LH: loop header
LB: loop body
LE: loop exit
PB: predicated region body
PF: predicated region fallthrough
CT: control target
= control target key end

     0   :  { %s1195_s0 = inlined_call_operand.hbm [shape: bf16[8,8,32], index: 0, kind: input, shape index: {}]   ;;  %s1196_s1 = inlined_call_operand.hbm [shape: bf16[8,8,32], index: 1, kind: input, shape index: {}]   ;;  %s1197_s2 = inlined_call_operand.hbm [shape: bf16[8,8,32], index: 2, kind: input, shape index: {}]   ;;  %s1198_s3 = inlined_call_operand.hbm [shape: f32[8,8,32], index: 3, kind: output, shape index: {}]  }
   0x1   :  { %1204 = sst [smem:[#allocation19_spill]] %s1196_s1 }
   0x2   :  { %8 = vsyncpa [#allocation7], 0 }
   0x3   :  { %10 = vsyncpa [#allocation7 + $0x1], 0 }
   0x4   :  { %11 = vsyncpa [#allocation10], 0 }
   0x5   :  { %13 = vsyncpa [#allocation10 + $0x1], 0 }
   0x6   :  { %14 = vsyncpa [#allocation8], 0 }
   0x7   :  { %16 = vsyncpa [#allocation8 + $0x1], 0  ;;  %s921_s12 = smov 0   ;;  %s923_s13 = smov 0  }
   0x8   :  { %s925_s14 = smov 0   ;;  %s927_s15 = smov 0  }
   0x9   :  { %s929_s16 = smov 0   ;;  %s931_s17 = smov 0  }
   0xa LB: > { %1205 = sst [smem:[#allocation16_spill]] %s887_s16  ;;  %s952_s18 = sadd.s32 4294967295, %s891_s17   ;;  %s891_s17 = sphi %s931_s17, %s22_s17   ;;  %s887_s16 = sphi %s929_s16, %s1225_s16   ;;  %s883_s15 = sphi %s927_s15, %s1224_s15   ;;  %s879_s14 = sphi %s925_s14, %s1228_s14   ;;  %s875_s13 = sphi %s923_s13, %s1227_s13   ;;  %s871_s12 = sphi %s921_s12, %s1226_s12  }
   0xb   : > { %s595_s19 = sadd.s32 4294967294, %s891_s17   ;;  %s41_s20 = sadd.s32 1, %s887_s16 }
   0xc   : > { %s50_s21 = sadd.s32 1, %s879_s14  ;;  %p43_p0 = scmp.ge.s32.totalorder %s41_s20, 8 }
   0xd   : > { %p57_p1 = scmp.ne.s32.totalorder %s879_s14, %s875_s13  ;;  %p58_p2 = scmp.eq.s32.totalorder %s891_s17, 0 }
   0xe   : > { %p63_p3 = scmp.ne.s32.totalorder %s875_s13, %s871_s12  ;;  %s1230_s20 = smov (%p43_p0, %s41_s20), 0 }
   0xf   : > { %1206 = sst [smem:[#allocation17_spill]] %s1230_s20  ;;  %p964_p4 = por %p58_p2, %p57_p1 }
  0x10   : > { %p64_p5 = scmp.eq.s32.totalorder %s952_s18, 0  ;;  %s45_s23 = ssub.s32 %s887_s16, %s1230_s20 }
  0x11   : > { %p145_p6 = scmp.eq.s32.totalorder %s952_s18, 7  ;;  %p48_p7 = scmp.eq.s32.totalorder %s45_s23, 0 }
  0x12   : > { %p972_p8 = por %p64_p5, %p63_p3  ;;  %p151_p10 = scmp.eq.s32.totalorder %s595_s19, 7 }
  0x13   : > { %p976_p9 = por %p145_p6, %p57_p1  ;;  %p653_p12 = scmp.lt.s32.totalorder %s891_s17, 8 }
  0x14   : > { %s1208_s24 = scalar_select %p972_p8, 1, 0 }
  0x15   : > { %s1209_s25 = scalar_select %p976_p9, 1, 0 }
  0x16   : > { %s981_s26 = scalar_select %p48_p7, %s879_s14, %s50_s21  }
  0x17   : > { %p983_p11 = por %p151_p10, %p63_p3  ;;  %s171_s28 = sand.u32 1, %s879_s14  }
  0x18   : > { %1210 = sst [smem:[#allocation18_spill]] %s981_s26  ;;  %s991_s29 = sshll.u32 %s171_s28, 2 }
  0x19   : > { %s1211_s27 = scalar_select %p983_p11, 1, 0 }
  0x1a   : > { %s994_s30 = sshll.u32 %s887_s16, 6  ;;  %p998_p13 = pnand %p653_p12, %p964_p4 }
  0x1b   : > { %s190_s5 = sand.u32 1, %s891_s17   ;;  %s1213_s1 = sld [smem:[#allocation19_spill]] }
  0x1c   : > { %s1212_s4 = scalar_select %p998_p13, 1, 0 }
  0x1d   : > { %s194_s9 = scalar_lea.vmem [#allocation9], %s991_s29  ;;  %s1014_s11 = scalar_lea.sflag [#allocation10], %s190_s5 }
  0x1e   : > { %s202_s10 = sshll.u32 %s194_s9, 4  ;;  %p1020_p3 = pneg %p998_p13  ;;  %s1011_s10 = int_to_ptr.vmem [resolvable:$true] %s202_s10 }
  0x21   : > { %s1007_s8 = scalar_lea.hbm %s1213_s1, %s994_s30  ;;  %s720_s6 = scalar_lea.hbm %s1213_s1, 512 }
  0x22   : > { %s715_s19 = scalar_lea.hbm %s1007_s8, 64  ;;  %p721_p6 = scmp.lt.u32.totalorder %s1007_s8, %s1213_s1 }
  0x23   : > { %p716_p2 = scmp.ne.s32.totalorder %s1007_s8, %s715_s19  ;;  %p722_p7 = scmp.lt.u32.totalorder %s720_s6, %s715_s19 }
  0x24   : > { %p724_p12 = scmp.lt.u32.totalorder %s715_s19, %s1007_s8 }
  0x25   : > { %p718_p4 = pnand %p1020_p3, %p716_p2  ;;  %p723_p10 = por %p722_p7, %p721_p6 }
  0x27   : > { %p719_p5 = pneg %p718_p4  ;;  %p725_p0 = por %p724_p12, %p723_p10 }
  0x29   : > { %p726_p1 = pnand %p725_p0, %p719_p5 }
  0x2b   : > { %729 = shalt.err (!%p726_p1)
}
  0x2c   : > { %s730_s5 = scalar_lea.vmem %s1011_s10, 64  ;;  %s893_s22 = smov [#allocation9]  }
  0x2d   : > { %p731_p2 = scmp.ne.s32.totalorder %s1011_s10, %s730_s5  ;;  %s735_s23 = sshll.u32 %s893_s22, 4  ;;  %s736_s23 = int_to_ptr.vmem [resolvable:$false] %s735_s23 }
  0x2e   : > { %s737_s7 = scalar_lea.vmem %s736_s23, 128  ;;  %p738_p9 = scmp.lt.s32.totalorder %s1011_s10, %s736_s23 }
  0x2f   : > { %p733_p4 = pnand %p731_p2, %p1020_p3  ;;  %p739_p8 = scmp.lt.s32.totalorder %s737_s7, %s730_s5 }
  0x31   : > { %p734_p11 = pneg %p733_p4  ;;  %p740_p6 = por %p739_p8, %p738_p9 }
  0x33   : > { %p741_p7 = pnand %p740_p6, %p734_p11 }
  0x35   : > { %744 = shalt.err (!%p741_p7)
}
  0x36   : > { %645 = dma.hbm_to_vmem [thread:$0]  (!%p998_p13), %s1007_s8, 64, %s1011_s10, %s1014_s11  }
  0x37   : > { %p1215_p0 = scmp.lt.s32.totalorder %s891_s17, 9  ;;  %p1216_p1 = scmp.ge.s32.totalorder %s891_s17, 1 }
  0x38   : > { %s1056_s5 = scalar_lea.hbm %s1195_s0, %s994_s30  ;;  %s175_s22 = scalar_lea.vmem [#allocation6], %s991_s29 }
  0x39   : > { %p1048_p5 = pnand %p1216_p1, %p1215_p0  ;;  %s183_s23 = sshll.u32 %s175_s22, 4  ;;  %s1059_s23 = int_to_ptr.vmem [resolvable:$true] %s183_s23 }
  0x3a   : > { %s1065_s7 = scalar_lea.hbm %s1197_s2, %s994_s30  ;;  %s172_s1 = scalar_lea.sflag [#allocation7], %s171_s28 }
  0x3b   : > { %s1217_s19 = scalar_select %p1048_p5, 1, 0 }
  0x3c   : > { %s745_s20 = scalar_lea.hbm %s1056_s5, 64  ;;  %s750_s16 = scalar_lea.hbm %s1195_s0, 512 }
  0x3d   : > { %p746_p8 = scmp.ne.s32.totalorder %s1056_s5, %s745_s20  ;;  %p751_p10 = scmp.lt.u32.totalorder %s1056_s5, %s1195_s0 }
  0x3e   : > { %p752_p12 = scmp.lt.u32.totalorder %s750_s16, %s745_s20  ;;  %p754_p4 = scmp.lt.u32.totalorder %s745_s20, %s1056_s5 }
  0x3f   : > { %p748_p9 = pnand %p746_p8, %p1020_p3 }
  0x40   : > { %p753_p2 = por %p752_p12, %p751_p10 }
  0x41   : > { %p749_p11 = pneg %p748_p9 }
  0x42   : > { %p755_p6 = por %p754_p4, %p753_p2 }
  0x44   : > { %p756_p7 = pnand %p755_p6, %p749_p11 }
  0x46   : > { %759 = shalt.err (!%p756_p7)
}
  0x47   : > { %s760_s28 = scalar_lea.vmem %s1059_s23, 64  ;;  %s894_s30 = smov [#allocation6]  }
  0x48   : > { %p761_p0 = scmp.ne.s32.totalorder %s1059_s23, %s760_s28  ;;  %s765_s8 = sshll.u32 %s894_s30, 4  ;;  %s766_s8 = int_to_ptr.vmem [resolvable:$false] %s765_s8 }
  0x49   : > { %s767_s26 = scalar_lea.vmem %s766_s8, 128  ;;  %p768_p9 = scmp.lt.s32.totalorder %s1059_s23, %s766_s8 }
  0x4a   : > { %p763_p1 = pnand %p761_p0, %p1020_p3  ;;  %p769_p5 = scmp.lt.s32.totalorder %s767_s26, %s760_s28 }
  0x4c   : > { %p764_p8 = pneg %p763_p1  ;;  %p770_p10 = por %p769_p5, %p768_p9 }
  0x4e   : > { %p771_p12 = pnand %p770_p10, %p764_p8 }
  0x50   : > { %774 = shalt.err (!%p771_p12)
}
  0x51   : > { %642 = dma.hbm_to_vmem [thread:$0]  (!%p998_p13), %s1056_s5, 64, %s1059_s23, %s172_s1  }
  0x52   : > { %s213_s16 = scalar_lea.vmem [#allocation11], %s991_s29  ;;  %s775_s10 = scalar_lea.hbm %s1065_s7, 64 }
  0x53   : > { %s221_s20 = sshll.u32 %s213_s16, 4  ;;  %p776_p11 = scmp.ne.s32.totalorder %s1065_s7, %s775_s10  ;;  %s222_s20 = int_to_ptr.vmem [resolvable:$true] %s221_s20 }
  0x54   : > { %s780_s22 = scalar_lea.hbm %s1197_s2, 512  ;;  %p781_p4 = scmp.lt.u32.totalorder %s1065_s7, %s1197_s2 }
  0x55   : > { %p778_p5 = pnand %p776_p11, %p1020_p3  ;;  %p782_p6 = scmp.lt.u32.totalorder %s780_s22, %s775_s10 }
  0x56   : > { %p784_p0 = scmp.lt.u32.totalorder %s775_s10, %s1065_s7 }
  0x57   : > { %p779_p2 = pneg %p778_p5  ;;  %p783_p7 = por %p782_p6, %p781_p4 }
  0x59   : > { %p785_p1 = por %p784_p0, %p783_p7 }
  0x5b   : > { %p786_p8 = pnand %p785_p1, %p779_p2 }
  0x5d   : > { %789 = shalt.err (!%p786_p8)
}
  0x5e   : > { %s790_s1 = scalar_lea.vmem %s222_s20, 64  ;;  %s895_s29 = smov [#allocation11]  }
  0x5f   : > { %p791_p9 = scmp.ne.s32.totalorder %s222_s20, %s790_s1  ;;  %s795_s5 = sshll.u32 %s895_s29, 4  ;;  %s796_s5 = int_to_ptr.vmem [resolvable:$false] %s795_s5 }
  0x60   : > { %s797_s23 = scalar_lea.vmem %s796_s5, 128  ;;  %p798_p11 = scmp.lt.s32.totalorder %s222_s20, %s796_s5 }
  0x61   : > { %p793_p10 = pnand %p791_p9, %p1020_p3  ;;  %p799_p5 = scmp.lt.s32.totalorder %s797_s23, %s790_s1 }
  0x63   : > { %p794_p12 = pneg %p793_p10  ;;  %p800_p13 = por %p799_p5, %p798_p11 }
  0x65   : > { %p801_p4 = pnand %p800_p13, %p794_p12 }
  0x67   : > { %804 = shalt.err (!%p801_p4)
}
  0x68   : > { %p1218_p6 = scmp.ne.s32.totalorder %s1212_s4, 0  ;;  %p1219_p2 = scmp.ne.s32.totalorder %s1217_s19, 0 }
  0x69   : > { %s1112_s21 = sand.u32 (!%p1219_p2), 1, %s875_s13   ;;  %p1220_p13 = scmp.ne.s32.totalorder (!%p1219_p2), %s1208_s24, 0 }
  0x6a   : > { %648 = dma.hbm_to_vmem [thread:$0]  (!%p1218_p6), %s1065_s7, 64, %s222_s20, %s1014_s11  }
  0x6b   : > { %230 = sbr.rel (%p1219_p2) target bundleno = 947 (0x3b3), region = 32  ;;  %s1115_s8 = sshll.u32 (!%p1219_p2), %s1112_s21, 2 }
  0x6c   : > { %s233_s26 = scalar_lea.sflag (!%p1219_p2), [#allocation7], %s1112_s21  ;;  %s236_s16 = scalar_lea.vmem (!%p1219_p2), [#allocation6], %s1115_s8 }
  0x72   : > { %858 = dma.done.wait (%p1220_p13), %s233_s26, 64  }
  0x73   : > { %860 = vsyncadd (%p1220_p13), %s233_s26, 4294967232  ;;  %s241_s4 = sand.u32 1, %s952_s18   ;;  %s245_s19 = scalar_lea.vmem [#allocation9], %s1115_s8 }
  0x74   : > { %s242_s11 = scalar_lea.sflag [#allocation10], %s241_s4 }
  0x75   : > { %862 = dma.done.wait (%p1220_p13), %s242_s11, 128  }
  0x76   : > { %864 = vsyncadd (%p1220_p13), %s242_s11, 4294967168  ;;  %vm295_vm0 = vcmask 261120   ;;  %v896_v0 = vmov 0.0   ;;  %vm897_vm1 = vmmov 0   ;;  %v304_v1 = vld [vmem:[%s245_s19] sm:$0xf] }
  0x77   : > { %619 = vmatprep.subr.bf16.mxu0 %v896_v0  ;;  %296 = vst.msk [vmem:[#allocation4] sm:$0xff] %vm295_vm0, %v896_v0  ;;  %621 = vmatprep.mubr.msk.bf16.mxu0 %vm897_vm1, %v896_v0  ;;  %v297_v2 = vld [vmem:[%s236_s16] sm:$0xf]  ;;  %v311_v3 = vsel %vm295_vm0, %v304_v1, 0  ;;  %vm301_vm2 = vcmask 257024   ;;  %vm292_vm3 = vcmask 7168  }
  0x78   : > { %625 = vmatprep.subr.bf16.mxu1 %v896_v0  ;;  %627 = vmatprep.mubr.msk.bf16.mxu1 %vm897_vm1, %v896_v0  ;;  %v298_v4 = vunpack.c.l.bf16 %v297_v2  ;;  %v898_v8 = vmov -1e+30   ;;  %294 = vst.msk [vmem:[#allocation3] sm:$0xff] %vm292_vm3, %v896_v0  ;;  %vm354_vm4 = vcmask 64512   ;;  %v899_v14 = vmov 0   ;;  %s254_s18 = scalar_lea.vmem [#allocation11], %s1115_s8 }
  0x79   : > { %620 = vmatpush3.bf16.xpose.msra.mxu0 %v311_v3  ;;  %293 = vst.msk [vmem:[#allocation2] sm:$0xff] %vm292_vm3, %v898_v8  ;;  %707 = vset.pattern.permute.xlu0 %v899_v14  ;;  %vm391_vm5 = vcmask 1043456   ;;  %v305_v19 = vld [vmem:[%s254_s18] sm:$0xf]  ;;  %s608_s24 = sshll.u32 %s1112_s21, 3  ;;  %s612_s7 = sshll.u32 %s883_s15, 7 }
  0x7a   : > { %v299_v5 = vmul.f32 0.17677669, %v298_v4  ;;  %708 = vset.pattern.permute.xlu1 %v899_v14  ;;  %v393_v20 = vsel %vm391_vm5, %v305_v19, 0  ;;  %s286_s20 = scalar_lea.vmem [#allocation12], %s608_s24  ;;  %s1146_s22 = scalar_lea.hbm %s1198_s3, %s612_s7 }
  0x7b   : > { %626 = vmatpush3.bf16.msra.mxu1 %v393_v20  ;;  %s466_s10 = sshll.u32 %s286_s20, 4  ;;  %s452_s28 = scalar_lea.sflag [#allocation8], %s1112_s21  ;;  %s1148_s10 = int_to_ptr.vmem [resolvable:$true] %s466_s10 }
  0x7c   : > { %v300_v6 = vpack.c.bf16 %v299_v5, %v299_v5  ;;  %s805_s30 = scalar_lea.vmem %s1148_s10, 128  ;;  %p1221_p7 = scmp.ne.s32.totalorder %s1209_s25, 0 }
  0x7d   : > { %p806_p3 = scmp.ne.s32.totalorder %s1148_s10, %s805_s30  ;;  %s900_s15 = smov [#allocation12]  }
  0x7e   : > { %302 = vst.msk [vmem:[#allocation5] sm:$0xf] %vm301_vm2, %v300_v6  ;;  %v381_v35 = vld [vmem:[#allocation4] sm:$0xff]  ;;  %s809_s1 = sshll.u32 %s900_s15, 4  ;;  %s810_s1 = int_to_ptr.vmem [resolvable:$false] %s809_s1 }
  0x7f   : > { %v372_v30 = vld [vmem:[#allocation3] sm:$0xff]  ;;  %p807_p0 = pnand %p806_p3, %p1221_p7  ;;  %s811_s29 = scalar_lea.vmem %s810_s1, 256 }
  0x80   : > { %v353_v15 = vld [vmem:[#allocation2] sm:$0xff]  ;;  %p812_p8 = scmp.lt.s32.totalorder %s1148_s10, %s810_s1  ;;  %p813_p9 = scmp.lt.s32.totalorder %s811_s29, %s805_s30 }
  0x81   : > { %p808_p1 = pneg %p807_p0 }
  0x82   : > { %p814_p10 = por %p813_p9, %p812_p8 }
  0x84   : > { %p815_p12 = pnand %p814_p10, %p808_p1 }
  0x85   : > { %v303_v7 = vld [vmem:[#allocation5] sm:$0xf] }
  0x86   : > { %622 = vmatmul.mubr.msk.bf16.vlgmr.msra.gmra.mrb[0].mxu0 %vm295_vm0, %v303_v7 }
 0x159   : > { %v347_v9 = vpop.f32.mrb[0].mxu0 }
 0x15a   : > { %v623_v10 = vpop.f32.mrb[1].mxu0  ;;  %v355_v11 = vsel %vm354_vm4, %v347_v9, -inf }
 0x15b   : > { %356 = vmax.xlane.f32.xlu0 %v355_v11  ;;  %v350_v12 = vpop.f32.mrb[2].mxu0 }
 0x15c   : > { %v624_v13 = vpop.f32.mrb[3].mxu0 }
 0x1e8   : > { %v357_v16 = vpop.xlane.xlu0 %356 }
 0x1e9   : > { %v358_v17 = vmax.f32 %v353_v15, %v357_v16 }
 0x1eb   : > { %v359_v18 = vsub.f32 %v353_v15, %v358_v17  ;;  %437 = vst.msk [vmem:[#allocation2] sm:$0xff] %vm292_vm3, %v358_v17  ;;  %364 = vperm.xlu0 %707, %v358_v17  }
 0x1ed   : > { %v360_v28 = vmul.f32 1.442695, %v359_v18 }
 0x26a   : > { %v365_v21 = vpop.permute.xlu0 %364 }
 0x26b   : > { %v367_v22 = vsub.f32 %v347_v9, %v365_v21 }
 0x26d   : > { %v368_v23 = vpack.c.bf16 %v367_v22, %v367_v22 }
 0x26f   : > { %v370_v24 = vmul.bf16 1069105081, %v368_v23 }
 0x271   : > { %709 = vpow.bf16 %v370_v24 }
 0x272   : > { %711 = vpow2.f32 %v360_v28 }
 0x27c   : > { %v710_v25 = vpop.eup %709 }
 0x27d   : > { %628 = vmatmul.mubr.msk.bf16.vlgmr.msra.gmra.mrb[0].mxu1 %vm354_vm4, %v710_v25  ;;  %v374_v26 = vunpack.c.l.bf16 %v710_v25  ;;  %v712_v29 = vpop.eup %711 }
 0x27e   : > { %v373_v31 = vmul.f32 %v712_v29, %v372_v30 }
 0x27f   : > { %v375_v27 = vsel %vm354_vm4, %v374_v26, 0.0 }
 0x280   : > { %376 = vadd.xlane.f32.xlu1 %v375_v27 }
 0x291   : > { %384 = vperm.xlu1 %708, %v712_v29  }
 0x30d   : > { %v377_v32 = vpop.xlane.xlu1 %376 }
 0x30e   : > { %v378_v33 = vadd.f32 %v377_v32, %v373_v31 }
 0x310   : > { %380 = vst.msk [vmem:[#allocation3] sm:$0xff] %vm292_vm3, %v378_v33 }
 0x311   : > { %v385_v36 = vpop.permute.xlu1 %384 }
 0x312   : > { %v387_v37 = vmul.f32 %v385_v36, %v381_v35 }
 0x317   : > { %v442_v34 = vld [vmem:[#allocation3] sm:$0xff] }
 0x318   : > { %445 = vperm.xlu1 %708, %v442_v34  }
 0x350   : > { %v429_v38 = vpop.f32.mrb[0].mxu1 }
 0x351   : > { %v435_v39 = vadd.f32 %v429_v38, %v387_v37  ;;  %v629_v40 = vpop.f32.mrb[1].mxu1 }
 0x352   : > { %v432_v41 = vpop.f32.mrb[2].mxu1 }
 0x353   : > { %436 = vst.msk [vmem:[#allocation4] sm:$0xff] %vm295_vm0, %v435_v39  ;;  %v630_v42 = vpop.f32.mrb[3].mxu1 }
 0x35a   : > { %v441_v45 = vld [vmem:[#allocation4] sm:$0xff] }
 0x397   : > { %v446_v43 = vpop.permute.xlu1 %445 }
 0x398   : > { %713 = vrcp.f32 %v446_v43 }
 0x3a2   : > { %v714_v44 = vpop.eup %713 }
 0x3a3   : > { %v449_v46 = vmul.f32 %v714_v44, %v441_v45 }
 0x3a5   : > { %450 = vst.msk [vmem:[%s286_s20] sm:$0xff] %vm295_vm0, %v449_v46 }
 0x3a6   : > { %818 = shalt.err (!%p815_p12)
}
 0x3a7   : > { %s819_s5 = scalar_lea.hbm %s1146_s22, 128  ;;  %s823_s8 = scalar_lea.hbm %s1198_s3, 1024 }
 0x3a8   : > { %p820_p11 = scmp.ne.s32.totalorder %s1146_s22, %s819_s5  ;;  %p824_p6 = scmp.lt.u32.totalorder %s1146_s22, %s1198_s3 }
 0x3a9   : > { %p825_p2 = scmp.lt.u32.totalorder %s823_s8, %s819_s5  ;;  %p827_p3 = scmp.lt.u32.totalorder %s819_s5, %s1146_s22 }
 0x3aa   : > { %p821_p5 = pnand %p820_p11, %p1221_p7 }
 0x3ab   : > { %p826_p13 = por %p825_p2, %p824_p6 }
 0x3ac   : > { %p822_p4 = pneg %p821_p5 }
 0x3ad   : > { %p828_p0 = por %p827_p3, %p826_p13 }
 0x3af   : > { %p829_p1 = pnand %p828_p0, %p822_p4 }
 0x3b1   : > { %832 = shalt.err (!%p829_p1)
}
 0x3b2   : > { %637 = dma.vmem_to_hbm [thread:$0]  (%p1221_p7), %s1148_s10, 128, %s1146_s22, %s452_s28  }
 0x3b3 PF: > { %p654_p8 = scmp.ge.s32.totalorder %s891_s17, 2  ;;  %s478_s4 = sand.u32 1, %s871_s12  }
 0x3b4   : > { %p1222_p9 = scmp.ne.s32.totalorder %s1211_s27, 0  ;;  %s479_s11 = scalar_lea.sflag [#allocation8], %s478_s4 }
 0x3b6   : > { %p650_p10 = pnand %p654_p8, %p1222_p9 }
 0x3b8   : > { %866 = dma.done.wait (!%p650_p10), %s479_s11, 128  }
 0x3b9   : > { %868 = vsyncadd (!%p650_p10), %s479_s11, 4294967168  ;;  %s22_s17 = sadd.s32 1, %s891_s17   ;;  %s1223_s25 = sld [smem:[#allocation18_spill]] }
 0x3ba   : > { %p19_p12 = scmp.ge.s32.totalorder %s22_s17, 10   ;;  %s1224_s15 = sld [smem:[#allocation16_spill]] }
 0x3bb   : > { %s1225_s16 = sld [smem:[#allocation17_spill]]  ;;  %s1226_s12 = smov %s875_s13 }
 0x3bc   : > { %s1227_s13 = smov %s879_s14  ;;  %21 = sbr.rel (!%p19_p12) target bundleno = 10 (0xa), region = 109 }
 0x3bf   : > { %s1228_s14 = smov %s1223_s25 }
 0x3c3   :  { %484 = vsyncpa [#allocation7], 1 }
 0x3c4   :  { %486 = vsyncpa [#allocation7 + $0x1], 1 }
 0x3c5   :  { %487 = vsyncpa [#allocation10], 1 }
 0x3c6   :  { %489 = vsyncpa [#allocation10 + $0x1], 1 }
 0x3c7   :  { %490 = vsyncpa [#allocation8], 1 }
 0x3c8   :  { %492 = vsyncpa [#allocation8 + $0x1], 1 }

</bundles_post_ra>
